<compile_context>
chip_gen: v6e
topology: v6e:2x2x1
jax: 0.10.0
libtpu: 0.0.40
codegen_flags: <defaults>
</compile_context>

<pallas_src>
import functools

import jax
import jax.numpy as jnp
from jax.experimental import pallas as pl
from jax.experimental.pallas import tpu as pltpu


def _gemm_bias_relu_kernel(w_ref, b_ref, p_ref, o_ref, *, use_relu):
    # w_ref: (Cout_p, KKC)     bf16   (same block every step -> stays resident)
    # b_ref: (Cout_p, 1)       f32
    # p_ref: (1, KKC, T)       bf16   im2col patch tile, T on the lane axis
    # o_ref: (1, Cout_p, T)    f32    lane-dense output tile
    acc = jnp.dot(w_ref[...], p_ref[0],
                  preferred_element_type=jnp.float32)       # MXU, (Cout_p, T)
    acc = acc + b_ref[...]                                   # VPU epilogue
    if use_relu:
        acc = jnp.maximum(acc, 0.0)
    o_ref[0] = acc.astype(o_ref.dtype)


def _pick_lane_tile(howo, kkc, cout_p, max_tile, vmem_budget_bytes):
    """Largest lane tile (multiple of 128) fitting the VMEM budget."""
    hw128 = ((howo + 127) // 128) * 128
    # Double-buffered per-lane bytes: bf16 patch column + f32 output column.
    per_lane = 2 * (kkc * 2 + cout_p * 4)
    t_budget = max(128, (vmem_budget_bytes // max(per_lane, 1)) // 128 * 128)
    return int(min(hw128, max_tile, t_budget))


def basic_conv(x_nchw, weight, bias=None, *, kernel_size, stride, relu=True,
               compute_dtype=jnp.bfloat16, max_tile=2048,
               vmem_budget_bytes=8 * 1024 * 1024):
    """BasicConv forward (transpose=False, norm=False path).

    x_nchw : (N, Cin, H, W)    float32 (PyTorch NCHW convention)
    weight : (Cout, Cin, K, K) float32 (PyTorch Conv2d weight layout)
    bias   : (Cout,) float32 or None
    returns (N, Cout, Ho, Wo)  float32
    """
    # TODO(synk): transpose=True (ConvTranspose2d) and norm=True (BatchNorm2d)
    # branches of BasicConv are not implemented (not on the default path).
    N, Cin, H, W = x_nchw.shape
    Cout = weight.shape[0]
    K = kernel_size
    pad = K // 2
    Ho = (H + 2 * pad - K) // stride + 1
    Wo = (W + 2 * pad - K) // stride + 1
    HoWo = Ho * Wo
    KKC = K * K * Cin

    if bias is None:
        bias = jnp.zeros((Cout,), jnp.float32)

    # ---- wrapper-side layout plumbing (XLA): pad, im2col, stride decimation.
    x_pad = jnp.pad(x_nchw, ((0, 0), (0, 0), (pad, pad), (pad, pad)))
    x_pad = x_pad.astype(compute_dtype)
    taps = []
    for kh in range(K):
        for kw in range(K):
            taps.append(x_pad[:, :,
                              kh:kh + stride * (Ho - 1) + 1:stride,
                              kw:kw + stride * (Wo - 1) + 1:stride])
    cols = jnp.stack(taps, axis=1)                 # (N, K*K, Cin, Ho, Wo)
    cols = cols.reshape(N, KKC, HoWo)              # (contraction, lane) layout

    # weight[co, ci, kh, kw] -> wmat[co, kh*K*Cin + kw*Cin + ci]
    wmat = jnp.transpose(weight, (0, 2, 3, 1)).reshape(Cout, KKC)
    wmat = wmat.astype(compute_dtype)
    b2d = bias.reshape(Cout, 1).astype(jnp.float32)

    # ---- pad Cout to a multiple of 8 (f32 sublane) so stores are unmasked.
    Cout_p = ((Cout + 7) // 8) * 8
    if Cout_p != Cout:
        wmat = jnp.pad(wmat, ((0, Cout_p - Cout), (0, 0)))
        b2d = jnp.pad(b2d, ((0, Cout_p - Cout), (0, 0)))

    # ---- lane-dense tiling of the Ho*Wo axis (multiples of 128).
    T = _pick_lane_tile(HoWo, KKC, Cout_p, max_tile, vmem_budget_bytes)
    HoWo_pad = ((HoWo + T - 1) // T) * T
    if HoWo_pad != HoWo:
        cols = jnp.pad(cols, ((0, 0), (0, 0), (0, HoWo_pad - HoWo)))
    n_tiles = HoWo_pad // T

    kernel = functools.partial(_gemm_bias_relu_kernel, use_relu=relu)

    bytes_in = (wmat.size * 2 + b2d.size * 4 + cols.size * 2)
    bytes_out = N * Cout_p * HoWo_pad * 4
    cost = pl.CostEstimate(
        flops=2 * N * Cout_p * KKC * HoWo_pad,
        transcendentals=0,
        bytes_accessed=bytes_in + bytes_out)

    out = pl.pallas_call(
        kernel,
        out_shape=jax.ShapeDtypeStruct((N, Cout_p, HoWo_pad), x_nchw.dtype),
        grid_spec=pltpu.PrefetchScalarGridSpec(
            num_scalar_prefetch=0,
            grid=(N, n_tiles),
            in_specs=[
                pl.BlockSpec((Cout_p, KKC), lambda n, t: (0, 0)),
                pl.BlockSpec((Cout_p, 1), lambda n, t: (0, 0)),
                pl.BlockSpec((1, KKC, T), lambda n, t: (n, 0, t)),
            ],
            out_specs=pl.BlockSpec((1, Cout_p, T), lambda n, t: (n, 0, t)),
        ),
        compiler_params=pltpu.CompilerParams(
            dimension_semantics=("parallel", "parallel")),
        cost_estimate=cost,
    )(wmat, b2d, cols)

    # Output is already channel-major: slice pads, pure reshape to NCHW.
    return out[:, :Cout, :HoWo].reshape(N, Cout, Ho, Wo)


if __name__ == "__main__":
    # BasicConv(in_channel=4, out_channel=8, kernel_size=3, stride=1,
    #           bias=True, norm=False, relu=True, transpose=False)
    N, Cin, H, W = 2, 4, 16, 16
    Cout, K, stride = 8, 3, 1

    key = jax.random.PRNGKey(0)
    kx, kw, kb = jax.random.split(key, 3)
    x = jax.random.normal(kx, (N, Cin, H, W), dtype=jnp.float32)
    # Deterministic synthetic parameters (shapes match nn.Conv2d(4, 8, 3)).
    fan_in = Cin * K * K
    bound = 1.0 / (fan_in ** 0.5)
    weight = jax.random.uniform(kw, (Cout, Cin, K, K), jnp.float32, -bound, bound)
    bias = jax.random.uniform(kb, (Cout,), jnp.float32, -bound, bound)

    out = basic_conv(x, weight, bias, kernel_size=K, stride=stride, relu=True)
    out = jax.block_until_ready(out)
    assert out.shape == (N, Cout, H, W)

    def ref_conv(xx, ww):
        r = jax.lax.conv_general_dilated(
            xx, ww, window_strides=(stride, stride),
            padding=[(K // 2, K // 2), (K // 2, K // 2)],
            dimension_numbers=("NCHW", "OIHW", "NCHW"))
        return jnp.maximum(r + bias.reshape(1, Cout, 1, 1), 0.0)

    # Tight check against a reference using the same bf16 input rounding
    # (kernel does bf16 x bf16 products with exact f32 accumulation on the MXU).
    ref_bf = ref_conv(x.astype(jnp.bfloat16).astype(jnp.float32),
                      weight.astype(jnp.bfloat16).astype(jnp.float32))
    assert jnp.allclose(out, ref_bf, atol=1e-3, rtol=1e-3), \
        "mismatch vs bf16-rounded reference conv"

    # Sanity check against the full-f32 reference (loose: bf16 input rounding).
    ref_f32 = ref_conv(x, weight)
    assert jnp.allclose(out, ref_f32, atol=5e-2, rtol=5e-2), \
        "mismatch vs f32 reference conv"

    print("KERNEL_OK")
</pallas_src>

<mosaic_0001>
module attributes {stable_mosaic.version = 11 : i64} {
  func.func @_gemm_bias_relu_kernel(%arg0: i32, %arg1: i32, %arg2: memref<8x36xbf16, #tpu.memory_space<vmem>>, %arg3: memref<8x1xf32, #tpu.memory_space<vmem>>, %arg4: memref<1x36x256xbf16, #tpu.memory_space<vmem>>, %arg5: memref<1x8x256xf32, #tpu.memory_space<vmem>>) attributes {dimension_semantics = [#tpu.dimension_semantics<parallel>, #tpu.dimension_semantics<parallel>], iteration_bounds = array<i64: 2, 1>, scalar_prefetch = 0 : i64, scratch_operands = 0 : i64, tpu.core_type = #tpu.core_type<tc>, window_params = [{pipeline_mode = #tpu.pipeline_mode<synchronous>, transform_indices = @transform_0, window_bounds = array<i64: 8, 36>}, {pipeline_mode = #tpu.pipeline_mode<synchronous>, transform_indices = @transform_1, window_bounds = array<i64: 8, 1>}, {transform_indices = @transform_2, window_bounds = array<i64: 1, 36, 256>}, {transform_indices = @transform_3, window_bounds = array<i64: 1, 8, 256>}]} {
    %c0 = arith.constant 0 : index
    %c0_0 = arith.constant 0 : index
    %0 = vector.load %arg2[%c0, %c0_0] : memref<8x36xbf16, #tpu.memory_space<vmem>>, vector<8x36xbf16>
    %c0_1 = arith.constant 0 : index
    %c0_2 = arith.constant 0 : index
    %c0_3 = arith.constant 0 : index
    %1 = vector.load %arg4[%c0_1, %c0_2, %c0_3] : memref<1x36x256xbf16, #tpu.memory_space<vmem>>, vector<1x36x256xbf16>
    %2 = vector.shape_cast %1 : vector<1x36x256xbf16> to vector<36x256xbf16>
    %cst = arith.constant dense<0.000000e+00> : vector<8x256xf32>
    %3 = tpu.matmul %0, %2, %cst {dimension_numbers = #tpu.dot_dimension_numbers<[1], [0], [0], [1], [0, 0, 1, 1], [], []>} : vector<8x36xbf16>, vector<36x256xbf16>, vector<8x256xf32> -> vector<8x256xf32>
    %c0_4 = arith.constant 0 : index
    %c0_5 = arith.constant 0 : index
    %4 = vector.load %arg3[%c0_4, %c0_5] : memref<8x1xf32, #tpu.memory_space<vmem>>, vector<8x1xf32>
    %5 = vector.broadcast %4 : vector<8x1xf32> to vector<8x256xf32>
    %6 = arith.addf %3, %5 : vector<8x256xf32>
    %cst_6 = arith.constant 0.000000e+00 : f32
    %7 = vector.broadcast %cst_6 : f32 to vector<8x256xf32>
    %8 = arith.maximumf %6, %7 : vector<8x256xf32>
    %c0_7 = arith.constant 0 : index
    %c0_8 = arith.constant 0 : index
    %c0_9 = arith.constant 0 : index
    %9 = vector.load %arg5[%c0_7, %c0_8, %c0_9] : memref<1x8x256xf32, #tpu.memory_space<vmem>>, vector<1x8x256xf32>
    %10 = vector.shape_cast %9 : vector<1x8x256xf32> to vector<8x256xf32>
    %11 = vector.shape_cast %8 : vector<8x256xf32> to vector<1x8x256xf32>
    tpu.vector_store %arg5[%c0_7, %c0_8, %c0_9], %11 {strides = array<i32>} : memref<1x8x256xf32, #tpu.memory_space<vmem>>, vector<1x8x256xf32>,
    return
  }
  func.func @transform_0(%arg0: i32, %arg1: i32) -> (i32, i32) {
    %c0_i32 = arith.constant 0 : i32
    %c0_i32_0 = arith.constant 0 : i32
    %c0_i32_1 = arith.constant 0 : i32
    return %c0_i32, %c0_i32_0 : i32, i32
  }
  func.func @transform_1(%arg0: i32, %arg1: i32) -> (i32, i32) {
    %c0_i32 = arith.constant 0 : i32
    %c0_i32_0 = arith.constant 0 : i32
    %c0_i32_1 = arith.constant 0 : i32
    return %c0_i32, %c0_i32_0 : i32, i32
  }
  func.func @transform_2(%arg0: i32, %arg1: i32) -> (i32, i32, i32) {
    %c0_i32 = arith.constant 0 : i32
    %c0_i32_0 = arith.constant 0 : i32
    return %arg0, %c0_i32, %arg1 : i32, i32, i32
  }
  func.func @transform_3(%arg0: i32, %arg1: i32) -> (i32, i32, i32) {
    %c0_i32 = arith.constant 0 : i32
    %c0_i32_0 = arith.constant 0 : i32
    return %arg0, %c0_i32, %arg1 : i32, i32, i32
  }
}

</mosaic_0001>

<bundles_post_ra>
// kernel: tpu_custom_call.1
= control target key start
LH: loop header
LB: loop body
LE: loop exit
PB: predicated region body
PF: predicated region fallthrough
CT: control target
= control target key end

     0   :  { %8 = vsyncpa [#allocation3], 0  ;;  %s685_s0 = inlined_call_operand.vmem [shape: bf16[8,36], index: 0, kind: input, shape index: {}]   ;;  %s686_s1 = inlined_call_operand.vmem [shape: f32[8,1], index: 1, kind: input, shape index: {}]   ;;  %s687_s2 = inlined_call_operand.vmem [shape: bf16[2,36,256], index: 2, kind: input, shape index: {}]   ;;  %s688_s3 = inlined_call_operand.hbm [shape: f32[2,8,256], index: 3, kind: output, shape index: {}]  }
   0x1   :  { %10 = vsyncpa [#allocation3 + $0x1], 0  ;;  %s574_s12 = smov 0   ;;  %s576_s13 = smov 0  }
   0x2   :  { %s578_s14 = smov 0   ;;  %s580_s15 = smov 0  }
   0x3   :  { %s582_s16 = smov 0   ;;  %s584_s17 = smov 0  }
   0x4 LB: > { %s387_s18 = sadd.s32 4294967295, %s550_s17   ;;  %s388_s19 = sadd.s32 4294967294, %s550_s17   ;;  %s550_s17 = sphi %s584_s17, %s16_s17   ;;  %s546_s16 = sphi %s582_s16, %s695_s16   ;;  %s542_s15 = sphi %s580_s15, %s694_s15   ;;  %s538_s14 = sphi %s578_s14, %s693_s14   ;;  %s534_s13 = sphi %s576_s13, %s692_s13   ;;  %s530_s12 = sphi %s574_s12, %s691_s12  }
   0x5   : > { %s28_s20 = sadd.s32 1, %s546_s16  ;;  %s107_s21 = sadd.s32 1, %s538_s14 }
   0x6   : > { %p30_p0 = scmp.ge.s32.totalorder %s28_s20, 2  ;;  %p117_p1 = scmp.ne.s32.totalorder %s538_s14, %s534_s13 }
   0x7   : > { %p118_p2 = scmp.eq.s32.totalorder %s387_s18, 1  ;;  %p123_p3 = scmp.ne.s32.totalorder %s534_s13, %s530_s12 }
   0x8   : > { %s697_s20 = smov (%p30_p0, %s28_s20), 0  ;;  %p124_p5 = scmp.eq.s32.totalorder %s388_s19, 1 }
   0x9   : > { %p614_p4 = por %p118_p2, %p117_p1  ;;  %s102_s23 = ssub.s32 %s546_s16, %s697_s20 }
   0xa   : > { %p391_p6 = scmp.ge.s32.totalorder %s550_s17, 1  ;;  %p105_p7 = scmp.eq.s32.totalorder %s102_s23, 0 }
   0xb   : > { %p621_p8 = por %p124_p5, %p123_p3  ;;  %p161_p9 = scmp.lt.s32.totalorder %s550_s17, 3 }
   0xc   : > { %s627_s25 = scalar_select %p105_p7, %s538_s14, %s107_s21  }
   0xd   : > { %p162_p10 = pnand %p391_p6, %p161_p9 }
   0xe   : > { %p190_p11 = scmp.lt.s32.totalorder (!%p162_p10), %s542_s15, 1  ;;  %s186_s8 = sand.u32 (!%p162_p10), 1, %s534_s13  }
   0xf   : > { %165 = sbr.rel (%p162_p10) target bundleno = 252 (0xfc), region = 32  ;;  %s392_s9 = sshll.u32 (!%p162_p10), %s186_s8, 4 }
  0x10   : > { %s407_s10 = sshll.u32 (!%p162_p10), %s542_s15, 8  ;;  %s188_s11 = scalar_lea.vmem (!%p162_p10), [#allocation2], %s392_s9 }
  0x11   : > { %s311_s18 = sshll.u32 (!%p162_p10), %s188_s11, 4  ;;  %s645_s23 = scalar_lea.hbm (!%p162_p10), %s688_s3, %s407_s10  ;;  %s312_s18 = int_to_ptr.vmem [resolvable:$true] %s311_s18 }
  0x12   : > { %s295_s26 = scalar_lea.sflag (!%p162_p10), [#allocation3], %s186_s8  ;;  %s474_s27 = scalar_lea.vmem (!%p162_p10), %s312_s18, 256 }
  0x13   : > { %p475_p12 = scmp.ne.s32.totalorder (!%p162_p10), %s312_s18, %s474_s27 }
  0x14   : > { %v552_v0 = vmov 0   ;;  %v207_v1 = vld [vmem:[%s686_s1] sm:$0xff]  ;;  %s191_s28 = scalar_select %p190_p11, %s542_s15, 1  ;;  %vm242_vm0 = vcmask 1041408   ;;  %vm238_vm1 = vcmask 293888  }
  0x15   : > { %281 = vmatprep.mubr.bf16.mxu0 %v552_v0  ;;  %465 = vset.pattern.permute.xlu0 %v552_v0  ;;  %v201_v10 = vld [vmem:[%s685_s0] sm:$0xf]  ;;  %p476_p13 = pnand %p475_p12, %p614_p4  ;;  %s553_s15 = smov [#allocation2]  }
  0x16   : > { %210 = vperm.xlu0 %465, %v207_v1   ;;  %s408_s29 = smul.u32 40, %s191_s28  ;;  %s478_s28 = sshll.u32 %s553_s15, 4  ;;  %s479_s28 = int_to_ptr.vmem [resolvable:$false] %s478_s28 }
  0x17   : > { %p477_p0 = pneg %p476_p13  ;;  %p481_p1 = scmp.lt.s32.totalorder %s312_s18, %s479_s28 }
  0x18   : > { %s197_s5 = scalar_lea.vmem %s687_s2, %s408_s29  ;;  %s480_s29 = scalar_lea.vmem %s479_s28, 512 }
  0x19   : > { %v206_v2 = vld [vmem:[%s197_s5 + $0x20] sm:$0x33]  ;;  %v468_v5 = vld [vmem:[%s197_s5 + $0x14] ss:$8 sps:$4 sm:$0xff]   ;;  %v470_v7 = vld [vmem:[%s197_s5 + $0x10] ss:$8 sps:$4 sm:$0xff]   ;;  %p482_p2 = scmp.lt.s32.totalorder %s480_s29, %s474_s27 }
  0x1a   : > { %v399_v3 = vcombine.high %v206_v2, %v206_v2  ;;  %v398_v4 = vcombine.low %v206_v2, %v206_v2  ;;  %v471_v8 = vld [vmem:[%s197_s5 + $0x4] ss:$8 sps:$4 sm:$0xff]   ;;  %v473_v9 = vld [vmem:[%s197_s5] ss:$8 sps:$4 sm:$0xff]  }
  0x1b   : > { %p483_p3 = por %p482_p2, %p481_p1 }
  0x1c   : > { %400 = vmatprep.subr.msk.bf16.mxu0 %vm242_vm0, %v399_v3  ;;  %v244_v6 = vsel %vm242_vm0, %v398_v4, 0 }
  0x1d   : > { %260 = vmatpush1.bf16.msra.mxu0 %v244_v6  ;;  %p484_p5 = pnand %p483_p3, %p477_p0 }
  0x1e   : > { %261 = vmatprep.subr.bf16.mxu0 %v468_v5 }
  0x21   : > { %262 = vmatpush1.bf16.msra.mxu0 %v470_v7 }
  0x22   : > { %263 = vmatprep.subr.bf16.mxu0 %v471_v8 }
  0x25   : > { %264 = vmatpush1.bf16.msra.mxu0 %v473_v9 }
  0x28   : > { %401 = vmatmul.mubr.msk.bf16.vlgmr.msra.gmra.mxu0 %vm238_vm1, %v201_v10 }
  0x91   : > { %v211_v11 = vpop.permute.xlu0 %210 }
  0xe8   : > { %v283_v12 = vpop.f32.mrf.mxu0 }
  0xe9   : > { %v284_v13 = vadd.f32 %v283_v12, %v211_v11 }
  0xea   : > { %v285_v14 = vpop.f32.mrf.mxu0 }
  0xeb   : > { %v290_v15 = vmax.f32 %v284_v13, 0.0  ;;  %v286_v16 = vadd.f32 %v285_v14, %v211_v11 }
  0xec   : > { %v287_v17 = vpop.f32.mrf.mxu0 }
  0xed   : > { %292 = vst [vmem:[%s188_s11] sm:$0xff] %v290_v15  ;;  %v291_v18 = vmax.f32 %v286_v16, 0.0 }
  0xee   : > { %v288_v19 = vpop.f32.mrf.mxu0 }
  0xef   : > { %293 = vst [vmem:[%s188_s11 + $0x8] sm:$0xff] %v291_v18 }
  0xf0   : > { %487 = shalt.err (!%p484_p5)
}
  0xf1   : > { %s488_s30 = scalar_lea.hbm %s645_s23, 256  ;;  %s492_s6 = scalar_lea.hbm %s688_s3, 512 }
  0xf2   : > { %p489_p6 = scmp.ne.s32.totalorder %s645_s23, %s488_s30  ;;  %p493_p10 = scmp.lt.s32.totalorder %s645_s23, %s688_s3 }
  0xf3   : > { %p494_p11 = scmp.lt.s32.totalorder %s492_s6, %s488_s30 }
  0xf4   : > { %p490_p7 = pnand %p489_p6, %p614_p4 }
  0xf5   : > { %p495_p12 = por %p494_p11, %p493_p10 }
  0xf6   : > { %p491_p9 = pneg %p490_p7 }
  0xf8   : > { %p496_p13 = pnand %p495_p12, %p491_p9 }
  0xfa   : > { %499 = shalt.err (!%p496_p13)
}
  0xfb   : > { %409 = dma.vmem_to_hbm [thread:$0]  (%p614_p4), %s312_s18, 256, %s645_s23, %s295_s26  }
  0xfc PF: > { %p415_p0 = scmp.ge.s32.totalorder %s550_s17, 2  ;;  %s323_s9 = sand.u32 1, %s530_s12  }
  0xfd   : > { %s324_s10 = scalar_lea.sflag [#allocation3], %s323_s9 }
  0xfe   : > { %p412_p1 = pnand %p415_p0, %p621_p8 }
 0x100   : > { %p413_p2 = pneg %p412_p1 }
 0x102   : > { %525 = dma.done.wait (%p413_p2), %s324_s10, 256  }
 0x103   : > { %527 = vsyncadd (%p413_p2), %s324_s10, 4294967040  ;;  %s16_s17 = sadd.s32 1, %s550_s17   ;;  %s691_s12 = smov %s534_s13 }
 0x104   : > { %p13_p3 = scmp.ge.s32.totalorder %s16_s17, 4   ;;  %s692_s13 = smov %s538_s14 }
 0x105   : > { %s693_s14 = smov %s627_s25  ;;  %s694_s15 = smov %s546_s16 }
 0x106   : > { %s695_s16 = smov %s697_s20  ;;  %15 = sbr.rel (!%p13_p3) target bundleno = 4 (0x4), region = 67 }
 0x10b   :  { %329 = vsyncpa [#allocation3], 1 }
 0x10c   :  { %331 = vsyncpa [#allocation3 + $0x1], 1 }

</bundles_post_ra>
